<compile_context>
chip_gen: v5e
topology: v5e:2x2
jax: 0.10.0
libtpu: 0.0.40
codegen_flags: <defaults>
</compile_context>

<pallas_src>
import functools
import math

import jax
import jax.numpy as jnp
from jax.experimental import pallas as pl
from jax.experimental.pallas import tpu as pltpu


def _policy_kernel(s_ref, z_ref, w1s_ref, w1z_ref, b1_ref,
                   w2_ref, b2_ref, w3_ref, b3_ref, o_ref, *, log):
    f32 = jnp.float32

    # layer 1: fused concat([s, z]) @ W1  ==  s @ W1[:s_dim] + z @ W1[s_dim:]
    # (operands in native dtype, f32 accumulation on the MXU)
    h1 = jnp.dot(s_ref[...], w1s_ref[...], preferred_element_type=f32)
    h1 = h1 + jnp.dot(z_ref[...], w1z_ref[...], preferred_element_type=f32)
    h1 = jnp.maximum(h1 + b1_ref[...].astype(f32), 0.0)

    # layer 2: Linear + ReLU
    w2 = w2_ref[...]
    h2 = jnp.dot(h1.astype(w2.dtype), w2, preferred_element_type=f32)
    h2 = jnp.maximum(h2 + b2_ref[...].astype(f32), 0.0)

    # layer 3: Linear -> logits
    w3 = w3_ref[...]
    logits = jnp.dot(h2.astype(w3.dtype), w3, preferred_element_type=f32)
    logits = logits + b3_ref[...].astype(f32)

    # numerically-stable (log-)softmax over the last axis, all in f32
    m = jnp.max(logits, axis=-1, keepdims=True)
    shifted = logits - m
    e = jnp.exp(shifted)
    denom = jnp.sum(e, axis=-1, keepdims=True)
    if log:
        out = shifted - jnp.log(denom)
    else:
        out = e / denom          # exact normalization: rows sum to 1
    o_ref[...] = out.astype(o_ref.dtype)


def policy_forward(s, z, params, log=False, *, block_b=1024):
    """Pallas equivalent of Policy.forward(s, z, log).

    s: [B, s_dim], z: [B, z_num]; params = (w1_s, w1_z, b1, w2, b2, w3, b3)
    with weights stored as [in_features, out_features] (W1 pre-split so the
    concat of (s, z) is fused into the kernel).
    """
    w1_s, w1_z, b1, w2, b2, w3, b3 = params
    B, s_dim = s.shape
    z_num = z.shape[1]
    hidden = w2.shape[0]
    a_num = w3.shape[1]

    # Batch tile: full batch if small, otherwise block_b rows per grid step
    # (block_b is a multiple of 8; minor dims equal the full array extents).
    tile_b = B if B <= block_b else block_b
    grid = (pl.cdiv(B, tile_b),)

    def row_spec(width):                       # batch-tiled activations
        return pl.BlockSpec((tile_b, width), lambda i: (i, 0))

    def resident_spec(shape):                  # VMEM-resident weights/biases
        return pl.BlockSpec(shape, lambda i: (0, 0))

    in_specs = [
        row_spec(s_dim),                 # s
        row_spec(z_num),                 # z
        resident_spec(w1_s.shape),       # W1 rows for s
        resident_spec(w1_z.shape),       # W1 rows for z
        resident_spec(b1.shape),
        resident_spec(w2.shape),
        resident_spec(b2.shape),
        resident_spec(w3.shape),
        resident_spec(b3.shape),
    ]
    out_specs = row_spec(a_num)

    nbytes = lambda a: int(a.size) * a.dtype.itemsize
    cost = pl.CostEstimate(
        flops=2 * B * ((s_dim + z_num) * hidden + hidden * hidden + hidden * a_num),
        transcendentals=B * (a_num + 1),
        bytes_accessed=(nbytes(s) + nbytes(z)
                        + sum(nbytes(p) for p in params)
                        + B * a_num * 4),
    )

    kernel = functools.partial(_policy_kernel, log=log)
    return pl.pallas_call(
        kernel,
        out_shape=jax.ShapeDtypeStruct((B, a_num), jnp.float32),
        grid_spec=pltpu.PrefetchScalarGridSpec(
            num_scalar_prefetch=0,
            grid=grid,
            in_specs=in_specs,
            out_specs=out_specs,
        ),
        compiler_params=pltpu.CompilerParams(
            dimension_semantics=("parallel",)),   # megacore-shardable
        cost_estimate=cost,
    )(s, z, w1_s, w1_z, b1, w2, b2, w3, b3)


def init_policy_params(key, s_dim, z_num, hidden, a_num, dtype=jnp.float32):
    """Matches nn.Linear's default init U(-1/sqrt(fan_in), +1/sqrt(fan_in)).
    Weights stored as [in_features, out_features]; W1 is split once into its
    s-rows / z-rows so the kernel fuses the (s, z) concat."""
    dims = [(s_dim + z_num, hidden), (hidden, hidden), (hidden, a_num)]
    raw = []
    for fan_in, fan_out in dims:
        key, kw, kb = jax.random.split(key, 3)
        bound = 1.0 / math.sqrt(fan_in)
        w = jax.random.uniform(kw, (fan_in, fan_out), dtype, -bound, bound)
        b = jax.random.uniform(kb, (1, fan_out), dtype, -bound, bound)
        raw.extend([w, b])
    w1, b1, w2, b2, w3, b3 = raw
    return (w1[:s_dim], w1[s_dim:], b1, w2, b2, w3, b3)


if __name__ == "__main__":
    # Small shapes consistent with the module's forward.
    B, s_dim, z_num, hidden, a_num = 8, 12, 4, 32, 6

    key = jax.random.PRNGKey(0)
    k_s, k_z, k_p = jax.random.split(key, 3)

    s = jax.random.normal(k_s, (B, s_dim), jnp.float32)
    # z is typically a one-hot skill indicator in DIAYN.
    # TODO(synk): if z is guaranteed one-hot, pass z_idx via scalar prefetch and
    # gather the W1_z row instead of the dense z matmul.
    z_idx = jax.random.randint(k_z, (B,), 0, z_num)
    z = jax.nn.one_hot(z_idx, z_num, dtype=jnp.float32)

    params = init_policy_params(k_p, s_dim, z_num, hidden, a_num)

    probs = policy_forward(s, z, params, log=False)
    log_probs = policy_forward(s, z, params, log=True)
    jax.block_until_ready(probs)
    jax.block_until_ready(log_probs)

    # pure-JAX reference
    w1_s, w1_z, b1, w2, b2, w3, b3 = params
    x = jnp.concatenate([s, z], axis=-1)
    w1 = jnp.concatenate([w1_s, w1_z], axis=0)
    h = jax.nn.relu(x @ w1 + b1)
    h = jax.nn.relu(h @ w2 + b2)
    logits = h @ w3 + b3
    ref_probs = jax.nn.softmax(logits, axis=-1)
    ref_logp = jax.nn.log_softmax(logits, axis=-1)

    assert probs.shape == (B, a_num)
    assert jnp.allclose(jnp.sum(probs, axis=-1), 1.0, atol=1e-5)
    assert jnp.allclose(probs, ref_probs, atol=1e-5)
    assert jnp.allclose(log_probs, ref_logp, atol=1e-4)
    assert jnp.allclose(jnp.exp(log_probs), probs, atol=1e-5)

    print("KERNEL_OK")
</pallas_src>

<mosaic_0001>
module attributes {stable_mosaic.version = 11 : i64} {
  func.func @_policy_kernel(%arg0: i32, %arg1: memref<8x12xf32, #tpu.memory_space<vmem>>, %arg2: memref<8x4xf32, #tpu.memory_space<vmem>>, %arg3: memref<12x32xf32, #tpu.memory_space<vmem>>, %arg4: memref<4x32xf32, #tpu.memory_space<vmem>>, %arg5: memref<1x32xf32, #tpu.memory_space<vmem>>, %arg6: memref<32x32xf32, #tpu.memory_space<vmem>>, %arg7: memref<1x32xf32, #tpu.memory_space<vmem>>, %arg8: memref<32x6xf32, #tpu.memory_space<vmem>>, %arg9: memref<1x6xf32, #tpu.memory_space<vmem>>, %arg10: memref<8x6xf32, #tpu.memory_space<vmem>>) attributes {dimension_semantics = [#tpu.dimension_semantics<parallel>], iteration_bounds = array<i64: 1>, scalar_prefetch = 0 : i64, scratch_operands = 0 : i64, tpu.core_type = #tpu.core_type<tc>, window_params = [{transform_indices = @transform_0, window_bounds = array<i64: 8, 12>}, {transform_indices = @transform_1, window_bounds = array<i64: 8, 4>}, {pipeline_mode = #tpu.pipeline_mode<synchronous>, transform_indices = @transform_2, window_bounds = array<i64: 12, 32>}, {pipeline_mode = #tpu.pipeline_mode<synchronous>, transform_indices = @transform_3, window_bounds = array<i64: 4, 32>}, {pipeline_mode = #tpu.pipeline_mode<synchronous>, transform_indices = @transform_4, window_bounds = array<i64: 1, 32>}, {pipeline_mode = #tpu.pipeline_mode<synchronous>, transform_indices = @transform_5, window_bounds = array<i64: 32, 32>}, {pipeline_mode = #tpu.pipeline_mode<synchronous>, transform_indices = @transform_6, window_bounds = array<i64: 1, 32>}, {pipeline_mode = #tpu.pipeline_mode<synchronous>, transform_indices = @transform_7, window_bounds = array<i64: 32, 6>}, {pipeline_mode = #tpu.pipeline_mode<synchronous>, transform_indices = @transform_8, window_bounds = array<i64: 1, 6>}, {transform_indices = @transform_9, window_bounds = array<i64: 8, 6>}]} {
    %c0 = arith.constant 0 : index
    %c0_0 = arith.constant 0 : index
    %0 = vector.load %arg1[%c0, %c0_0] : memref<8x12xf32, #tpu.memory_space<vmem>>, vector<8x12xf32>
    %c0_1 = arith.constant 0 : index
    %c0_2 = arith.constant 0 : index
    %1 = vector.load %arg3[%c0_1, %c0_2] : memref<12x32xf32, #tpu.memory_space<vmem>>, vector<12x32xf32>
    %cst = arith.constant dense<0.000000e+00> : vector<8x32xf32>
    %2 = tpu.matmul %0, %1, %cst {dimension_numbers = #tpu.dot_dimension_numbers<[1], [0], [0], [1], [0, 0, 1, 1], [], []>} : vector<8x12xf32>, vector<12x32xf32>, vector<8x32xf32> -> vector<8x32xf32>
    %c0_3 = arith.constant 0 : index
    %c0_4 = arith.constant 0 : index
    %3 = vector.load %arg2[%c0_3, %c0_4] : memref<8x4xf32, #tpu.memory_space<vmem>>, vector<8x4xf32>
    %c0_5 = arith.constant 0 : index
    %c0_6 = arith.constant 0 : index
    %4 = vector.load %arg4[%c0_5, %c0_6] : memref<4x32xf32, #tpu.memory_space<vmem>>, vector<4x32xf32>
    %cst_7 = arith.constant dense<0.000000e+00> : vector<8x32xf32>
    %5 = tpu.matmul %3, %4, %cst_7 {dimension_numbers = #tpu.dot_dimension_numbers<[1], [0], [0], [1], [0, 0, 1, 1], [], []>} : vector<8x4xf32>, vector<4x32xf32>, vector<8x32xf32> -> vector<8x32xf32>
    %6 = arith.addf %2, %5 : vector<8x32xf32>
    %c0_8 = arith.constant 0 : index
    %c0_9 = arith.constant 0 : index
    %7 = vector.load %arg5[%c0_8, %c0_9] : memref<1x32xf32, #tpu.memory_space<vmem>>, vector<1x32xf32>
    %8 = vector.broadcast %7 : vector<1x32xf32> to vector<8x32xf32>
    %9 = arith.addf %6, %8 : vector<8x32xf32>
    %cst_10 = arith.constant 0.000000e+00 : f32
    %10 = vector.broadcast %cst_10 : f32 to vector<8x32xf32>
    %11 = arith.maximumf %9, %10 : vector<8x32xf32>
    %c0_11 = arith.constant 0 : index
    %c0_12 = arith.constant 0 : index
    %12 = vector.load %arg6[%c0_11, %c0_12] : memref<32x32xf32, #tpu.memory_space<vmem>>, vector<32x32xf32>
    %cst_13 = arith.constant dense<0.000000e+00> : vector<8x32xf32>
    %13 = tpu.matmul %11, %12, %cst_13 {dimension_numbers = #tpu.dot_dimension_numbers<[1], [0], [0], [1], [0, 0, 1, 1], [], []>} : vector<8x32xf32>, vector<32x32xf32>, vector<8x32xf32> -> vector<8x32xf32>
    %c0_14 = arith.constant 0 : index
    %c0_15 = arith.constant 0 : index
    %14 = vector.load %arg7[%c0_14, %c0_15] : memref<1x32xf32, #tpu.memory_space<vmem>>, vector<1x32xf32>
    %15 = vector.broadcast %14 : vector<1x32xf32> to vector<8x32xf32>
    %16 = arith.addf %13, %15 : vector<8x32xf32>
    %cst_16 = arith.constant 0.000000e+00 : f32
    %17 = vector.broadcast %cst_16 : f32 to vector<8x32xf32>
    %18 = arith.maximumf %16, %17 : vector<8x32xf32>
    %c0_17 = arith.constant 0 : index
    %c0_18 = arith.constant 0 : index
    %19 = vector.load %arg8[%c0_17, %c0_18] : memref<32x6xf32, #tpu.memory_space<vmem>>, vector<32x6xf32>
    %cst_19 = arith.constant dense<0.000000e+00> : vector<8x6xf32>
    %20 = tpu.matmul %18, %19, %cst_19 {dimension_numbers = #tpu.dot_dimension_numbers<[1], [0], [0], [1], [0, 0, 1, 1], [], []>} : vector<8x32xf32>, vector<32x6xf32>, vector<8x6xf32> -> vector<8x6xf32>
    %c0_20 = arith.constant 0 : index
    %c0_21 = arith.constant 0 : index
    %21 = vector.load %arg9[%c0_20, %c0_21] : memref<1x6xf32, #tpu.memory_space<vmem>>, vector<1x6xf32>
    %22 = vector.broadcast %21 : vector<1x6xf32> to vector<8x6xf32>
    %23 = arith.addf %20, %22 : vector<8x6xf32>
    %cst_22 = arith.constant dense<0xFF800000> : vector<8xf32>
    %24 = vector.multi_reduction <maximumf>, %23, %cst_22 [1] : vector<8x6xf32> to vector<8xf32>
    %25 = vector.shape_cast %24 : vector<8xf32> to vector<8x1xf32>
    %26 = vector.broadcast %25 : vector<8x1xf32> to vector<8x6xf32>
    %27 = arith.subf %23, %26 : vector<8x6xf32>
    %28 = math.exp %27 : vector<8x6xf32>
    %cst_23 = arith.constant dense<0.000000e+00> : vector<8xf32>
    %29 = vector.multi_reduction <add>, %28, %cst_23 [1] : vector<8x6xf32> to vector<8xf32>
    %30 = vector.shape_cast %29 : vector<8xf32> to vector<8x1xf32>
    %31 = vector.broadcast %30 : vector<8x1xf32> to vector<8x6xf32>
    %32 = arith.divf %28, %31 : vector<8x6xf32>
    %c0_24 = arith.constant 0 : index
    %c0_25 = arith.constant 0 : index
    %33 = vector.load %arg10[%c0_24, %c0_25] : memref<8x6xf32, #tpu.memory_space<vmem>>, vector<8x6xf32>
    tpu.vector_store %arg10[%c0_24, %c0_25], %32 {strides = array<i32>} : memref<8x6xf32, #tpu.memory_space<vmem>>, vector<8x6xf32>,
    return
  }
  func.func @transform_0(%arg0: i32) -> (i32, i32) {
    %c0_i32 = arith.constant 0 : i32
    %c0_i32_0 = arith.constant 0 : i32
    return %arg0, %c0_i32 : i32, i32
  }
  func.func @transform_1(%arg0: i32) -> (i32, i32) {
    %c0_i32 = arith.constant 0 : i32
    %c0_i32_0 = arith.constant 0 : i32
    return %arg0, %c0_i32 : i32, i32
  }
  func.func @transform_2(%arg0: i32) -> (i32, i32) {
    %c0_i32 = arith.constant 0 : i32
    %c0_i32_0 = arith.constant 0 : i32
    %c0_i32_1 = arith.constant 0 : i32
    return %c0_i32, %c0_i32_0 : i32, i32
  }
  func.func @transform_3(%arg0: i32) -> (i32, i32) {
    %c0_i32 = arith.constant 0 : i32
    %c0_i32_0 = arith.constant 0 : i32
    %c0_i32_1 = arith.constant 0 : i32
    return %c0_i32, %c0_i32_0 : i32, i32
  }
  func.func @transform_4(%arg0: i32) -> (i32, i32) {
    %c0_i32 = arith.constant 0 : i32
    %c0_i32_0 = arith.constant 0 : i32
    %c0_i32_1 = arith.constant 0 : i32
    return %c0_i32, %c0_i32_0 : i32, i32
  }
  func.func @transform_5(%arg0: i32) -> (i32, i32) {
    %c0_i32 = arith.constant 0 : i32
    %c0_i32_0 = arith.constant 0 : i32
    %c0_i32_1 = arith.constant 0 : i32
    return %c0_i32, %c0_i32_0 : i32, i32
  }
  func.func @transform_6(%arg0: i32) -> (i32, i32) {
    %c0_i32 = arith.constant 0 : i32
    %c0_i32_0 = arith.constant 0 : i32
    %c0_i32_1 = arith.constant 0 : i32
    return %c0_i32, %c0_i32_0 : i32, i32
  }
  func.func @transform_7(%arg0: i32) -> (i32, i32) {
    %c0_i32 = arith.constant 0 : i32
    %c0_i32_0 = arith.constant 0 : i32
    %c0_i32_1 = arith.constant 0 : i32
    return %c0_i32, %c0_i32_0 : i32, i32
  }
  func.func @transform_8(%arg0: i32) -> (i32, i32) {
    %c0_i32 = arith.constant 0 : i32
    %c0_i32_0 = arith.constant 0 : i32
    %c0_i32_1 = arith.constant 0 : i32
    return %c0_i32, %c0_i32_0 : i32, i32
  }
  func.func @transform_9(%arg0: i32) -> (i32, i32) {
    %c0_i32 = arith.constant 0 : i32
    %c0_i32_0 = arith.constant 0 : i32
    return %arg0, %c0_i32 : i32, i32
  }
}

</mosaic_0001>

<bundles_post_ra>
// kernel: tpu_custom_call.1
= control target key start
LH: loop header
LB: loop body
LE: loop exit
PB: predicated region body
PF: predicated region fallthrough
CT: control target
= control target key end

     0   :  { %14 = vsyncpa [#allocation3], 0  ;;  %s475_s0 = inlined_call_operand.hbm [shape: f32[8,12], index: 0, kind: input, shape index: {}]   ;;  %s476_s1 = inlined_call_operand.vmem [shape: f32[8,4], index: 1, kind: input, shape index: {}]   ;;  %s477_s2 = inlined_call_operand.vmem [shape: f32[12,32], index: 2, kind: input, shape index: {}]   ;;  %s478_s3 = inlined_call_operand.hbm [shape: f32[4,32], index: 3, kind: input, shape index: {}]   ;;  %s479_s4 = inlined_call_operand.vmem [shape: f32[1,32], index: 4, kind: input, shape index: {}]   ;;  %s480_s5 = inlined_call_operand.vmem [shape: f32[32,32], index: 5, kind: input, shape index: {}]   ;;  %s481_s6 = inlined_call_operand.hbm [shape: f32[1,32], index: 6, kind: input, shape index: {}]   ;;  %s482_s7 = inlined_call_operand.vmem [shape: f32[32,6], index: 7, kind: input, shape index: {}]   ;;  %s483_s8 = inlined_call_operand.vmem [shape: f32[1,6], index: 8, kind: input, shape index: {}]   ;;  %s484_s9 = inlined_call_operand.hbm [shape: f32[8,6], index: 9, kind: output, shape index: {}]  }
   0x1   :  { %15 = vsyncpa [#allocation6], 0  ;;  %s37_s11 = sshll.u32 %s478_s3, 4  ;;  %s38_s11 = int_to_ptr.hbm [resolvable:$true] %s37_s11 }
   0x2   :  { %16 = vsyncpa [#allocation4], 0  ;;  %s367_s12 = smov [#allocation5]   ;;  %s22_s16 = sshll.u32 %s475_s0, 4  ;;  %s23_s16 = int_to_ptr.hbm [resolvable:$true] %s22_s16 }
   0x3   :  { %s39_s13 = sshll.u32 %s367_s12, 4  ;;  %s368_s17 = smov [#allocation2]   ;;  %s40_s13 = int_to_ptr.vmem [resolvable:$true] %s39_s13 }
   0x4   :  { %42 = dma.hbm_to_vmem [thread:$0]  %s38_s11, 64, %s40_s13, [#allocation6]  }
   0x5   :  { %s24_s18 = sshll.u32 %s368_s17, 4  ;;  %s52_s21 = sshll.u32 %s481_s6, 4  ;;  %s25_s18 = int_to_ptr.vmem [resolvable:$true] %s24_s18  ;;  %s53_s21 = int_to_ptr.hbm [resolvable:$true] %s52_s21 }
   0x6   :  { %27 = dma.hbm_to_vmem [thread:$0]  %s23_s16, 128, %s25_s18, [#allocation3]  }
   0x7   :  { %s369_s3 = smov [#allocation7]  }
   0x8   :  { %s54_s22 = sshll.u32 %s369_s3, 4  ;;  %s55_s22 = int_to_ptr.vmem [resolvable:$true] %s54_s22 }
   0x9   :  { %57 = dma.hbm_to_vmem [thread:$0]  %s53_s21, 16, %s55_s22, [#allocation6]  }
   0xa   :  { %361 = dma.done.wait [#allocation3], 128  }
   0xb   :  { %362 = vsyncadd [#allocation3], 4294967168 }
   0xc   :  { %363 = dma.done.wait [#allocation6], 80  }
   0xd   :  { %364 = vsyncadd [#allocation6], 4294967216  ;;  %vm83_vm0 = vcmask 1043456   ;;  %vm79_vm1 = vcmask 31744   ;;  %v76_v0 = vld [vmem:[%s477_s2 + $0x8] sm:$0xf] }
   0xe   :  { %v78_v1 = vld [vmem:[#allocation5] sm:$0xf]  ;;  %v75_v2 = vld [vmem:[%s477_s2] sm:$0xff]  ;;  %250 = vmatpush.msk.msra.mxu1 %vm83_vm0, %v76_v0  ;;  %vm107_vm2 = vcmask 97280   ;;  %v143_v5 = vld [vmem:[%s480_s5 + $0x18] sm:$0xff]  ;;  %vm148_vm3 = vcmask 261120  }
   0xf   :  { %248 = vmatpush.msk.msra.mxu0 %vm83_vm0, %v78_v1  ;;  %v77_v3 = vld [vmem:[%s476_s1] sm:$0xff]  ;;  %164 = vmatpush.msra.mxu2 %v143_v5  ;;  %v142_v6 = vld [vmem:[%s480_s5 + $0x10] sm:$0xff]  ;;  %v141_v7 = vld [vmem:[%s480_s5 + $0x8] sm:$0xff]  ;;  %vm204_vm4 = vcmask 48128   ;;  %s237_s0 = sshll.u32 %s484_s9, 4  ;;  %s238_s0 = int_to_ptr.hbm [resolvable:$true] %s237_s0 }
  0x10   :  { %v74_v4 = vld [vmem:[#allocation2] sm:$0xff]  ;;  %249 = vmatmul.msk.f32.vlgmr.msra.gmra.mxu0 %vm79_vm1, %v77_v3  ;;  %129 = vmatpush.msra.mxu1 %v75_v2  ;;  %v176_v9 = vld [vmem:[%s482_s7 + $0x18] sm:$0xff]  ;;  %v175_v16 = vld [vmem:[%s482_s7 + $0x10] sm:$0xff] }
  0x11   :  { %251 = vmatmul.msk.f32.vlgmr.msra.gmra.mxu1 %vm107_vm2, %v74_v4  ;;  %165 = vmatpush.msra.mxu2 %v142_v6  ;;  %v140_v8 = vld [vmem:[%s480_s5] sm:$0xff]  ;;  %v174_v17 = vld [vmem:[%s482_s7 + $0x8] sm:$0xff] }
  0x12   :  { %196 = vmatpush.msra.mxu3 %v176_v9  ;;  %v258_v11 = vld [vmem:[%s479_s4] ss:$0 sm:$0xff]  ;;  %v259_v19 = vld [vmem:[#allocation7] ss:$0 sm:$0xff] }
  0x13   :  { %166 = vmatpush.msra.mxu2 %v141_v7  ;;  %v173_v18 = vld [vmem:[%s482_s7] sm:$0xff]  ;;  %s370_s7 = smov [#allocation8]  }
  0x14   :  { %197 = vmatpush.msra.mxu3 %v175_v16  ;;  %v260_v23 = vld [vmem:[%s483_s8] ss:$0 sm:$0xff]  ;;  %s235_s8 = sshll.u32 %s370_s7, 4  ;;  %s236_s8 = int_to_ptr.vmem [resolvable:$true] %s235_s8 }
  0x15   :  { %167 = vmatpush.msra.mxu2 %v140_v8 }
  0x16   :  { %198 = vmatpush.msra.mxu3 %v174_v17 }
  0x18   :  { %199 = vmatpush.msra.mxu3 %v173_v18 }
  0x8d   :  { %v104_v10 = vpop.f32.mrf.mxu0 }
  0x8e   :  { %v131_v12 = vpop.f32.mrf.mxu1 }
  0x8f   :  { %v132_v13 = vadd.f32 %v131_v12, %v104_v10 }
  0x91   :  { %v138_v14 = vadd.f32 %v258_v11, %v132_v13 }
  0x93   :  { %v139_v15 = vmax.f32 %v138_v14, 0.0 }
  0x95   :  { %252 = vmatmul.msk.f32.vlgmr.msra.gmra.mxu2 %vm148_vm3, %v139_v15 }
 0x118   :  { %v169_v20 = vpop.f32.mrf.mxu2 }
 0x119   :  { %v170_v21 = vadd.f32 %v259_v19, %v169_v20 }
 0x11b   :  { %v172_v22 = vmax.f32 %v170_v21, 0.0 }
 0x11d   :  { %253 = vmatmul.msk.f32.vlgmr.msra.gmra.mxu3 %vm148_vm3, %v172_v22 }
 0x1a0   :  { %v201_v24 = vpop.f32.mrf.mxu3 }
 0x1a1   :  { %v202_v25 = vadd.f32 %v260_v23, %v201_v24 }
 0x1a3   :  { %v205_v26 = vsel %vm204_vm4, %v202_v25, -inf }
 0x1a4   :  { %206 = vmax.xlane.f32.xlu0 %v205_v26 }
 0x217   :  { %v207_v27 = vpop.xlane.xlu0 %206 }
 0x218   :  { %v208_v28 = vsub.f32 %v202_v25, %v207_v27 }
 0x21a   :  { %v209_v29 = vmul.f32 1.442695, %v208_v28 }
 0x21c   :  { %261 = vpow2.f32 %v209_v29 }
 0x222   :  { %v262_v30 = vpop.eup %261 }
 0x223   :  { %v211_v31 = vsel %vm204_vm4, %v262_v30, 0.0 }
 0x224   :  { %212 = vadd.xlane.f32.xlu0 %v211_v31 }
 0x297   :  { %v213_v32 = vpop.xlane.xlu0 %212 }
 0x298   :  { %263 = vrcp.f32 %v213_v32  ;;  %v225_v36 = vand.u32 2147483648, %v213_v32  ;;  %v223_v38 = vand.u32 2147483647, %v213_v32  ;;  %vm219_vm6 = vweird.f32 %v213_v32 }
 0x29a   :  { %v226_v40 = vor.u32 1.1754944e-38, %v225_v36  ;;  %vm224_vm8 = vcmp.eq.f32.partialorder %v223_v38, 8.507059e+37 }
 0x29e   :  { %v264_v33 = vpop.eup %263 }
 0x29f   :  { %v215_v34 = vmul.f32 %v264_v33, %v213_v32  ;;  %vm220_vm5 = vweird.f32 %v264_v33 }
 0x2a0   :  { %vm221_vm7 = vmor %vm219_vm6, %vm220_vm5 }
 0x2a1   :  { %v216_v35 = vsub.f32 1.0, %v215_v34 }
 0x2a3   :  { %v217_v37 = vmul.f32 %v264_v33, %v216_v35 }
 0x2a5   :  { %v218_v39 = vadd.f32 %v264_v33, %v217_v37 }
 0x2a7   :  { %v222_v41 = vsel %vm221_vm7, %v264_v33, %v218_v39 }
 0x2a8   :  { %v227_v42 = vsel %vm224_vm8, %v226_v40, %v222_v41 }
 0x2a9   :  { %v228_v43 = vmul.f32 %v262_v30, %v227_v42 }
 0x2ab   :  { %229 = vst.msk [vmem:[#allocation8] sm:$0xff] %vm204_vm4, %v228_v43 }
 0x2ac   :  { %240 = dma.vmem_to_hbm [thread:$0]  %s236_s8, 128, %s238_s0, [#allocation4]  }
 0x2ad   :  { %365 = dma.done.wait [#allocation4], 128  }
 0x2ae   :  { %366 = vsyncadd [#allocation4], 4294967168 }
 0x2af   :  { %245 = vsyncpa [#allocation3], 1 }
 0x2b0   :  { %246 = vsyncpa [#allocation6], 1 }
 0x2b1   :  { %247 = vsyncpa [#allocation4], 1 }

</bundles_post_ra>
